<compile_context>
chip_gen: v6e
topology: v6e:2x2x1
jax: 0.10.0
libtpu: 0.0.40
codegen_flags: <defaults>
</compile_context>

<pallas_src>
import numpy as np
import jax
import jax.numpy as jnp
from jax.experimental import pallas as pl
from jax.experimental.pallas import tpu as pltpu


_SMALL_K_MAX = 8      # rank cutoff below which direct masked-min extraction wins
_BISECT_ITERS = 32    # an int32 key interval collapses to width 1 in <= 32 halvings
_INT32_SIGN = int(-2 ** 31)
_INT32_MAX = int(2 ** 31 - 1)


def _quantile_pos(q, n):
    # torch/np 'linear' interpolation: pos = q*(n-1), blend floor/ceil statistics.
    pos = q * (n - 1)
    k_lo = int(np.floor(pos))
    k_hi = int(np.ceil(pos))
    return k_lo, k_hi, float(pos - k_lo)


def _make_prox_kernel(N, NP, TR):
    """Kernel over a (TR, NP) row tile; each row is one flattened (b,c) image."""
    # TODO(synk): assumes no NaNs in x (then torch.nanquantile == torch.quantile).
    assert N < (1 << 24), "f32 rank counts are exact only for N < 2**24"
    k1_lo, k1_hi, f1 = _quantile_pos(0.01, N)
    k99_lo, k99_hi, f99 = _quantile_pos(0.99, N)
    m99_hi = N - 1 - k99_hi          # top-ranks, used by the small-k path
    m99_lo = N - 1 - k99_lo
    pad_cols = NP != N
    small_k = (k1_hi <= _SMALL_K_MAX) and (m99_lo <= _SMALL_K_MAX)

    def small_k_quantiles(x, valid):
        # Direct extraction of successive distinct values (cheap when the
        # needed ranks sit within a handful of elements from either end).
        f32 = jnp.float32
        if valid is not None:
            x_low = jnp.where(valid, x, jnp.inf)     # pads never win a min / count
            x_high = jnp.where(valid, x, -jnp.inf)   # pads never win a max / count
        else:
            x_low, x_high = x, x

        v = jnp.min(x_low, axis=-1, keepdims=True)
        cnt = jnp.sum((x_low <= v).astype(f32), axis=-1, keepdims=True)
        os1_lo, found1_lo = v, cnt >= float(k1_lo + 1)
        os1_hi, found1_hi = v, cnt >= float(k1_hi + 1)
        for _ in range(k1_hi):
            v = jnp.min(jnp.where(x_low > v, x_low, jnp.inf), axis=-1, keepdims=True)
            cnt = jnp.sum((x_low <= v).astype(f32), axis=-1, keepdims=True)
            os1_lo = jnp.where(found1_lo, os1_lo, v)
            found1_lo = jnp.logical_or(found1_lo, cnt >= float(k1_lo + 1))
            os1_hi = jnp.where(found1_hi, os1_hi, v)
            found1_hi = jnp.logical_or(found1_hi, cnt >= float(k1_hi + 1))
        i1 = os1_lo + (os1_hi - os1_lo) * f1

        v = jnp.max(x_high, axis=-1, keepdims=True)
        cnt = jnp.sum((x_high >= v).astype(f32), axis=-1, keepdims=True)
        os99_hi, found99_hi = v, cnt >= float(m99_hi + 1)
        os99_lo, found99_lo = v, cnt >= float(m99_lo + 1)
        for _ in range(m99_lo):
            v = jnp.max(jnp.where(x_high < v, x_high, -jnp.inf), axis=-1, keepdims=True)
            cnt = jnp.sum((x_high >= v).astype(f32), axis=-1, keepdims=True)
            os99_hi = jnp.where(found99_hi, os99_hi, v)
            found99_hi = jnp.logical_or(found99_hi, cnt >= float(m99_hi + 1))
            os99_lo = jnp.where(found99_lo, os99_lo, v)
            found99_lo = jnp.logical_or(found99_lo, cnt >= float(m99_lo + 1))
        i99 = os99_lo + (os99_hi - os99_lo) * f99
        return i1, i99

    def bisect_quantiles(x, valid):
        # Exact order statistics via binary search over order-preserving int32
        # keys; pass count is independent of N.
        f32 = jnp.float32
        sign = jnp.int32(_INT32_SIGN)
        big = jnp.int32(_INT32_MAX)

        xi = pltpu.bitcast(x, jnp.int32)
        # negative floats: flip all bits then the sign bit -> total order matches floats
        keys = jnp.where(xi >= 0, xi, jnp.bitwise_xor(jnp.bitwise_not(xi), sign))
        if valid is not None:
            row_max = jnp.max(jnp.where(valid, keys, sign), axis=-1, keepdims=True)
            keys = jnp.where(valid, keys, big)   # pads never counted / never the min
        else:
            row_max = jnp.max(keys, axis=-1, keepdims=True)
        row_min = jnp.min(keys, axis=-1, keepdims=True)

        def key_to_f32(k):
            i = jnp.where(k >= 0, k, jnp.bitwise_not(jnp.bitwise_xor(k, sign)))
            return pltpu.bitcast(i, jnp.float32)

        # Invariant per search: count(<= lo) < k+1 <= count(<= hi); answer in (lo, hi].
        lo0 = row_min - 1          # finite keys never hit int32 min, so no underflow
        hi0 = row_max

        def body(_, carry):
            lo1, hi1, lo99, hi99 = carry
            # overflow-free floor((lo+hi)/2) for signed int32
            mid1 = jnp.bitwise_and(lo1, hi1) + jnp.right_shift(jnp.bitwise_xor(lo1, hi1), 1)
            mid99 = jnp.bitwise_and(lo99, hi99) + jnp.right_shift(jnp.bitwise_xor(lo99, hi99), 1)
            c1 = jnp.sum((keys <= mid1).astype(f32), axis=-1, keepdims=True)
            c99 = jnp.sum((keys <= mid99).astype(f32), axis=-1, keepdims=True)
            p1 = c1 >= float(k1_lo + 1)
            p99 = c99 >= float(k99_lo + 1)
            return (jnp.where(p1, lo1, mid1), jnp.where(p1, mid1, hi1),
                    jnp.where(p99, lo99, mid99), jnp.where(p99, mid99, hi99))

        _, v1_key, _, v99_key = jax.lax.fori_loop(
            0, _BISECT_ITERS, body, (lo0, hi0, lo0, hi0))

        def interp(v_key, k_lo, k_hi, frac):
            v_lo = key_to_f32(v_key)
            if k_hi == k_lo or frac == 0.0:
                return v_lo
            # neighbouring order statistic: either the same value (ties) or the
            # smallest strictly-larger key
            cnt = jnp.sum((keys <= v_key).astype(f32), axis=-1, keepdims=True)
            nxt = jnp.min(jnp.where(keys > v_key, keys, big), axis=-1, keepdims=True)
            v_hi = jnp.where(cnt >= float(k_hi + 1), v_lo, key_to_f32(nxt))
            return v_lo + (v_hi - v_lo) * frac

        return (interp(v1_key, k1_lo, k1_hi, f1),
                interp(v99_key, k99_lo, k99_hi, f99))

    def kernel(alpha_ref, beta_ref, x_ref, o_ref):
        x = x_ref[...]                       # (TR, NP) f32
        alpha = alpha_ref[0]
        beta = beta_ref[0]
        f32 = jnp.float32

        if pad_cols:
            # (1, NP) validity row; broadcast inside jnp.where, never materialised
            # at (TR, NP).
            valid = jax.lax.broadcasted_iota(jnp.int32, (1, NP), 1) < N
        else:
            valid = None

        if small_k:
            i1, i99 = small_k_quantiles(x, valid)        # (TR,1) each
        else:
            i1, i99 = bisect_quantiles(x, valid)         # (TR,1) each

        # ---- thresholded, sigmoid-gated ReLU; all per-row scalars stay (TR,1).
        th = i1 + (i99 - i1) * alpha                     # (TR,1)
        mask = (th > 1e-14).astype(f32)                  # (TR,1)
        th_new = th * mask + (1.0 - mask)                # (TR,1)
        # EUP approximate reciprocal + one Newton step: full f32 accuracy, no
        # divide on the VALU (and it's only a (TR,1) column op anyway).
        inv = pl.reciprocal(th_new, approx=True)
        inv = inv * (2.0 - th_new * inv)
        scale = beta * inv                               # (TR,1)
        th_eff = th * mask                               # (TR,1)
        z = scale * (jnp.abs(x) - th_eff)                # (TR,NP)
        # sigmoid(z) == 0.5*(tanh(z/2)+1): routed to the EUP, no (TR,NP) divide.
        sig = 0.5 * (jnp.tanh(0.5 * z) + 1.0)
        o_ref[...] = jnp.maximum(x, 0.0) * sig

    return kernel


def _round_up(v, m):
    return ((v + m - 1) // m) * m


def _vmem_capacity_bytes():
    try:
        return int(pltpu.get_tpu_info().vmem_capacity_bytes)
    except Exception:
        return 64 * 1024 * 1024        # conservative (v7x per-TensorCore VMEM)


def _choose_tiling(R, NP):
    """Pick the row-tile size and scoped-VMEM limit from the chip's VMEM."""
    vmem = _vmem_capacity_bytes()
    if vmem >= 100 * 1024 * 1024:      # v5e / v6e: 128 MiB VMEM -> bigger tiles
        target_bytes, vmem_limit = 4 << 20, 96 * 1024 * 1024
    else:                              # v7x: 64 MiB per TC -> conservative
        target_bytes, vmem_limit = 3 << 19, 40 * 1024 * 1024

    tr = max(8, (target_bytes // (NP * 4)) // 8 * 8)
    tr = min(tr, max(8, (R // 8) * 8))          # never (much) larger than R
    if R % 8 == 0:
        if tr >= R and R >= 16:
            # >=2 grid steps so a 2-TensorCore chip (v7x) can shard the
            # "parallel" row axis across cores.
            tr = max(8, (R // 2) // 8 * 8)
        for cand in range(tr, 7, -8):           # prefer an exact divisor of R
            if R % cand == 0:
                tr = cand
                break

    # TODO(synk): very large rows (e.g. 512x512 images, NP*4*8 = 8 MiB tiles)
    # would need a column-split counting path to stay inside v7x's 64 MiB VMEM.
    tile_bytes = tr * NP * 4
    vmem_limit = max(vmem_limit, min(8 * tile_bytes, (vmem * 7) // 8))
    return tr, vmem_limit


def prox_forward(x, alpha, beta):
    """x: (B, C, H, W); alpha, beta: shape-(1,) float32 params."""
    B, C, H, W = x.shape
    R, N = B * C, H * W
    NP = _round_up(max(N, 128), 128)
    TR, vmem_limit = _choose_tiling(R, NP)

    x2 = x.reshape(R, N).astype(jnp.float32)
    if NP != N:
        # Columns must be lane-padded (kernel masks them); rows are never padded:
        # the cdiv grid's partial edge block is garbage-computed and write-clipped.
        x2 = jnp.pad(x2, ((0, 0), (0, NP - N)))

    out = pl.pallas_call(
        _make_prox_kernel(N, NP, TR),
        out_shape=jax.ShapeDtypeStruct((R, NP), jnp.float32),
        grid=(pl.cdiv(R, TR),),
        in_specs=[
            pl.BlockSpec(memory_space=pltpu.MemorySpace.SMEM),   # alpha (1,)
            pl.BlockSpec(memory_space=pltpu.MemorySpace.SMEM),   # beta  (1,)
            pl.BlockSpec((TR, NP), lambda i: (i, 0)),            # x row tile
        ],
        out_specs=pl.BlockSpec((TR, NP), lambda i: (i, 0)),
        compiler_params=pltpu.CompilerParams(
            dimension_semantics=("parallel",),
            vmem_limit_bytes=vmem_limit),
    )(alpha.astype(jnp.float32), beta.astype(jnp.float32), x2)

    if NP != N:
        out = out[:, :N]
    return out.reshape(B, C, H, W)


def prox_ref(x, alpha, beta):
    # Pure-JAX reference mirroring the PyTorch forward (no NaNs assumed).
    B, C, H, W = x.shape
    x2 = x.reshape(B * C, H * W)
    i1 = jnp.quantile(x2, 0.01, axis=1, keepdims=True)
    i99 = jnp.quantile(x2, 0.99, axis=1, keepdims=True)
    th = (i1 + (i99 - i1) * alpha[0]).reshape(B, C, 1, 1)
    th = jnp.broadcast_to(th, (B, C, H, W))
    mask = (th > 1e-14).astype(jnp.float32)
    th_new = th * mask + (1.0 - mask)
    return jax.nn.relu(x) / (1.0 + jnp.exp(-(beta[0] / th_new *
                                             (jnp.abs(x) - th * mask))))


if __name__ == "__main__":
    key = jax.random.PRNGKey(0)

    # Deterministic parameter init matching Prox.__init__ defaults.
    alpha = jnp.full((1,), 0.95, dtype=jnp.float32)
    beta = jnp.full((1,), 8.0, dtype=jnp.float32)

    shapes = [
        (2, 4, 16, 16),   # small-k extraction path, lane-aligned columns
        (2, 4, 64, 64),   # bisection rank-search path
        (3, 4, 12, 12),   # column lane-padding + partial (write-clipped) row tile
    ]
    for i, shp in enumerate(shapes):
        k = jax.random.fold_in(key, i)
        x = jax.random.normal(k, shp, dtype=jnp.float32)
        out = jax.block_until_ready(prox_forward(x, alpha, beta))
        ref = jax.block_until_ready(prox_ref(x, alpha, beta))
        np.testing.assert_allclose(np.asarray(out), np.asarray(ref),
                                   rtol=5e-4, atol=5e-5)

    print("KERNEL_OK")
</pallas_src>

<mosaic_0001>
module attributes {stable_mosaic.version = 11 : i64} {
  func.func @kernel(%arg0: i32, %arg1: memref<1xf32, #tpu.memory_space<smem>>, %arg2: memref<1xf32, #tpu.memory_space<smem>>, %arg3: memref<8x256xf32, #tpu.memory_space<vmem>>, %arg4: memref<8x256xf32, #tpu.memory_space<vmem>>) attributes {dimension_semantics = [#tpu.dimension_semantics<parallel>], iteration_bounds = array<i64: 1>, scalar_prefetch = 0 : i64, scratch_operands = 0 : i64, tpu.core_type = #tpu.core_type<tc>, window_params = [{transform_indices = @transform_0, window_bounds = array<i64: 1>}, {transform_indices = @transform_1, window_bounds = array<i64: 1>}, {transform_indices = @transform_2, window_bounds = array<i64: 8, 256>}, {transform_indices = @transform_3, window_bounds = array<i64: 8, 256>}]} {
    %c0 = arith.constant 0 : index
    %c0_0 = arith.constant 0 : index
    %0 = vector.load %arg3[%c0, %c0_0] : memref<8x256xf32, #tpu.memory_space<vmem>>, vector<8x256xf32>
    %c0_1 = arith.constant 0 : index
    %1 = memref.load %arg1[%c0_1] : memref<1xf32, #tpu.memory_space<smem>>
    %c0_2 = arith.constant 0 : index
    %2 = memref.load %arg2[%c0_2] : memref<1xf32, #tpu.memory_space<smem>>
    %cst = arith.constant dense<0x7F800000> : vector<8xf32>
    %3 = vector.multi_reduction <minimumf>, %0, %cst [1] : vector<8x256xf32> to vector<8xf32>
    %4 = vector.shape_cast %3 : vector<8xf32> to vector<8x1xf32>
    %5 = vector.broadcast %4 : vector<8x1xf32> to vector<8x256xf32>
    %6 = arith.cmpf ole, %0, %5 : vector<8x256xf32>
    %7 = arith.extui %6 : vector<8x256xi1> to vector<8x256xi32>
    %8 = arith.sitofp %7 : vector<8x256xi32> to vector<8x256xf32>
    %cst_3 = arith.constant dense<0.000000e+00> : vector<8xf32>
    %9 = vector.multi_reduction <add>, %8, %cst_3 [1] : vector<8x256xf32> to vector<8xf32>
    %10 = vector.shape_cast %9 : vector<8xf32> to vector<8x1xf32>
    %cst_4 = arith.constant 3.000000e+00 : f32
    %11 = vector.broadcast %cst_4 : f32 to vector<8x1xf32>
    %12 = arith.cmpf oge, %10, %11 : vector<8x1xf32>
    %cst_5 = arith.constant 4.000000e+00 : f32
    %13 = vector.broadcast %cst_5 : f32 to vector<8x1xf32>
    %14 = arith.cmpf oge, %10, %13 : vector<8x1xf32>
    %15 = vector.broadcast %4 : vector<8x1xf32> to vector<8x256xf32>
    %16 = arith.cmpf ogt, %0, %15 : vector<8x256xf32>
    %cst_6 = arith.constant 0x7F800000 : f32
    %17 = vector.broadcast %cst_6 : f32 to vector<8x256xf32>
    %18 = arith.select %16, %0, %17 : vector<8x256xi1>, vector<8x256xf32>
    %cst_7 = arith.constant dense<0x7F800000> : vector<8xf32>
    %19 = vector.multi_reduction <minimumf>, %18, %cst_7 [1] : vector<8x256xf32> to vector<8xf32>
    %20 = vector.shape_cast %19 : vector<8xf32> to vector<8x1xf32>
    %21 = vector.broadcast %20 : vector<8x1xf32> to vector<8x256xf32>
    %22 = arith.cmpf ole, %0, %21 : vector<8x256xf32>
    %23 = arith.extui %22 : vector<8x256xi1> to vector<8x256xi32>
    %24 = arith.sitofp %23 : vector<8x256xi32> to vector<8x256xf32>
    %cst_8 = arith.constant dense<0.000000e+00> : vector<8xf32>
    %25 = vector.multi_reduction <add>, %24, %cst_8 [1] : vector<8x256xf32> to vector<8xf32>
    %26 = vector.shape_cast %25 : vector<8xf32> to vector<8x1xf32>
    %27 = arith.select %12, %4, %20 : vector<8x1xi1>, vector<8x1xf32>
    %cst_9 = arith.constant 3.000000e+00 : f32
    %28 = vector.broadcast %cst_9 : f32 to vector<8x1xf32>
    %29 = arith.cmpf oge, %26, %28 : vector<8x1xf32>
    %30 = arith.ori %12, %29 : vector<8x1xi1>
    %31 = arith.select %14, %4, %20 : vector<8x1xi1>, vector<8x1xf32>
    %cst_10 = arith.constant 4.000000e+00 : f32
    %32 = vector.broadcast %cst_10 : f32 to vector<8x1xf32>
    %33 = arith.cmpf oge, %26, %32 : vector<8x1xf32>
    %34 = arith.ori %14, %33 : vector<8x1xi1>
    %35 = vector.broadcast %20 : vector<8x1xf32> to vector<8x256xf32>
    %36 = arith.cmpf ogt, %0, %35 : vector<8x256xf32>
    %cst_11 = arith.constant 0x7F800000 : f32
    %37 = vector.broadcast %cst_11 : f32 to vector<8x256xf32>
    %38 = arith.select %36, %0, %37 : vector<8x256xi1>, vector<8x256xf32>
    %cst_12 = arith.constant dense<0x7F800000> : vector<8xf32>
    %39 = vector.multi_reduction <minimumf>, %38, %cst_12 [1] : vector<8x256xf32> to vector<8xf32>
    %40 = vector.shape_cast %39 : vector<8xf32> to vector<8x1xf32>
    %41 = vector.broadcast %40 : vector<8x1xf32> to vector<8x256xf32>
    %42 = arith.cmpf ole, %0, %41 : vector<8x256xf32>
    %43 = arith.extui %42 : vector<8x256xi1> to vector<8x256xi32>
    %44 = arith.sitofp %43 : vector<8x256xi32> to vector<8x256xf32>
    %cst_13 = arith.constant dense<0.000000e+00> : vector<8xf32>
    %45 = vector.multi_reduction <add>, %44, %cst_13 [1] : vector<8x256xf32> to vector<8xf32>
    %46 = vector.shape_cast %45 : vector<8xf32> to vector<8x1xf32>
    %47 = arith.select %30, %27, %40 : vector<8x1xi1>, vector<8x1xf32>
    %cst_14 = arith.constant 3.000000e+00 : f32
    %48 = vector.broadcast %cst_14 : f32 to vector<8x1xf32>
    %49 = arith.cmpf oge, %46, %48 : vector<8x1xf32>
    %50 = arith.ori %30, %49 : vector<8x1xi1>
    %51 = arith.select %34, %31, %40 : vector<8x1xi1>, vector<8x1xf32>
    %cst_15 = arith.constant 4.000000e+00 : f32
    %52 = vector.broadcast %cst_15 : f32 to vector<8x1xf32>
    %53 = arith.cmpf oge, %46, %52 : vector<8x1xf32>
    %54 = arith.ori %34, %53 : vector<8x1xi1>
    %55 = vector.broadcast %40 : vector<8x1xf32> to vector<8x256xf32>
    %56 = arith.cmpf ogt, %0, %55 : vector<8x256xf32>
    %cst_16 = arith.constant 0x7F800000 : f32
    %57 = vector.broadcast %cst_16 : f32 to vector<8x256xf32>
    %58 = arith.select %56, %0, %57 : vector<8x256xi1>, vector<8x256xf32>
    %cst_17 = arith.constant dense<0x7F800000> : vector<8xf32>
    %59 = vector.multi_reduction <minimumf>, %58, %cst_17 [1] : vector<8x256xf32> to vector<8xf32>
    %60 = vector.shape_cast %59 : vector<8xf32> to vector<8x1xf32>
    %61 = arith.select %50, %47, %60 : vector<8x1xi1>, vector<8x1xf32>
    %62 = arith.select %54, %51, %60 : vector<8x1xi1>, vector<8x1xf32>
    %63 = arith.subf %62, %61 : vector<8x1xf32>
    %cst_18 = arith.constant 5.500000e-01 : f32
    %64 = vector.broadcast %cst_18 : f32 to vector<8x1xf32>
    %65 = arith.mulf %63, %64 : vector<8x1xf32>
    %66 = arith.addf %61, %65 : vector<8x1xf32>
    %cst_19 = arith.constant dense<0xFF800000> : vector<8xf32>
    %67 = vector.multi_reduction <maximumf>, %0, %cst_19 [1] : vector<8x256xf32> to vector<8xf32>
    %68 = vector.shape_cast %67 : vector<8xf32> to vector<8x1xf32>
    %69 = vector.broadcast %68 : vector<8x1xf32> to vector<8x256xf32>
    %70 = arith.cmpf oge, %0, %69 : vector<8x256xf32>
    %71 = arith.extui %70 : vector<8x256xi1> to vector<8x256xi32>
    %72 = arith.sitofp %71 : vector<8x256xi32> to vector<8x256xf32>
    %cst_20 = arith.constant dense<0.000000e+00> : vector<8xf32>
    %73 = vector.multi_reduction <add>, %72, %cst_20 [1] : vector<8x256xf32> to vector<8xf32>
    %74 = vector.shape_cast %73 : vector<8xf32> to vector<8x1xf32>
    %cst_21 = arith.constant 3.000000e+00 : f32
    %75 = vector.broadcast %cst_21 : f32 to vector<8x1xf32>
    %76 = arith.cmpf oge, %74, %75 : vector<8x1xf32>
    %cst_22 = arith.constant 4.000000e+00 : f32
    %77 = vector.broadcast %cst_22 : f32 to vector<8x1xf32>
    %78 = arith.cmpf oge, %74, %77 : vector<8x1xf32>
    %79 = vector.broadcast %68 : vector<8x1xf32> to vector<8x256xf32>
    %80 = arith.cmpf olt, %0, %79 : vector<8x256xf32>
    %cst_23 = arith.constant 0xFF800000 : f32
    %81 = vector.broadcast %cst_23 : f32 to vector<8x256xf32>
    %82 = arith.select %80, %0, %81 : vector<8x256xi1>, vector<8x256xf32>
    %cst_24 = arith.constant dense<0xFF800000> : vector<8xf32>
    %83 = vector.multi_reduction <maximumf>, %82, %cst_24 [1] : vector<8x256xf32> to vector<8xf32>
    %84 = vector.shape_cast %83 : vector<8xf32> to vector<8x1xf32>
    %85 = vector.broadcast %84 : vector<8x1xf32> to vector<8x256xf32>
    %86 = arith.cmpf oge, %0, %85 : vector<8x256xf32>
    %87 = arith.extui %86 : vector<8x256xi1> to vector<8x256xi32>
    %88 = arith.sitofp %87 : vector<8x256xi32> to vector<8x256xf32>
    %cst_25 = arith.constant dense<0.000000e+00> : vector<8xf32>
    %89 = vector.multi_reduction <add>, %88, %cst_25 [1] : vector<8x256xf32> to vector<8xf32>
    %90 = vector.shape_cast %89 : vector<8xf32> to vector<8x1xf32>
    %91 = arith.select %76, %68, %84 : vector<8x1xi1>, vector<8x1xf32>
    %cst_26 = arith.constant 3.000000e+00 : f32
    %92 = vector.broadcast %cst_26 : f32 to vector<8x1xf32>
    %93 = arith.cmpf oge, %90, %92 : vector<8x1xf32>
    %94 = arith.ori %76, %93 : vector<8x1xi1>
    %95 = arith.select %78, %68, %84 : vector<8x1xi1>, vector<8x1xf32>
    %cst_27 = arith.constant 4.000000e+00 : f32
    %96 = vector.broadcast %cst_27 : f32 to vector<8x1xf32>
    %97 = arith.cmpf oge, %90, %96 : vector<8x1xf32>
    %98 = arith.ori %78, %97 : vector<8x1xi1>
    %99 = vector.broadcast %84 : vector<8x1xf32> to vector<8x256xf32>
    %100 = arith.cmpf olt, %0, %99 : vector<8x256xf32>
    %cst_28 = arith.constant 0xFF800000 : f32
    %101 = vector.broadcast %cst_28 : f32 to vector<8x256xf32>
    %102 = arith.select %100, %0, %101 : vector<8x256xi1>, vector<8x256xf32>
    %cst_29 = arith.constant dense<0xFF800000> : vector<8xf32>
    %103 = vector.multi_reduction <maximumf>, %102, %cst_29 [1] : vector<8x256xf32> to vector<8xf32>
    %104 = vector.shape_cast %103 : vector<8xf32> to vector<8x1xf32>
    %105 = vector.broadcast %104 : vector<8x1xf32> to vector<8x256xf32>
    %106 = arith.cmpf oge, %0, %105 : vector<8x256xf32>
    %107 = arith.extui %106 : vector<8x256xi1> to vector<8x256xi32>
    %108 = arith.sitofp %107 : vector<8x256xi32> to vector<8x256xf32>
    %cst_30 = arith.constant dense<0.000000e+00> : vector<8xf32>
    %109 = vector.multi_reduction <add>, %108, %cst_30 [1] : vector<8x256xf32> to vector<8xf32>
    %110 = vector.shape_cast %109 : vector<8xf32> to vector<8x1xf32>
    %111 = arith.select %94, %91, %104 : vector<8x1xi1>, vector<8x1xf32>
    %cst_31 = arith.constant 3.000000e+00 : f32
    %112 = vector.broadcast %cst_31 : f32 to vector<8x1xf32>
    %113 = arith.cmpf oge, %110, %112 : vector<8x1xf32>
    %114 = arith.ori %94, %113 : vector<8x1xi1>
    %115 = arith.select %98, %95, %104 : vector<8x1xi1>, vector<8x1xf32>
    %cst_32 = arith.constant 4.000000e+00 : f32
    %116 = vector.broadcast %cst_32 : f32 to vector<8x1xf32>
    %117 = arith.cmpf oge, %110, %116 : vector<8x1xf32>
    %118 = arith.ori %98, %117 : vector<8x1xi1>
    %119 = vector.broadcast %104 : vector<8x1xf32> to vector<8x256xf32>
    %120 = arith.cmpf olt, %0, %119 : vector<8x256xf32>
    %cst_33 = arith.constant 0xFF800000 : f32
    %121 = vector.broadcast %cst_33 : f32 to vector<8x256xf32>
    %122 = arith.select %120, %0, %121 : vector<8x256xi1>, vector<8x256xf32>
    %cst_34 = arith.constant dense<0xFF800000> : vector<8xf32>
    %123 = vector.multi_reduction <maximumf>, %122, %cst_34 [1] : vector<8x256xf32> to vector<8xf32>
    %124 = vector.shape_cast %123 : vector<8xf32> to vector<8x1xf32>
    %125 = arith.select %114, %111, %124 : vector<8x1xi1>, vector<8x1xf32>
    %126 = arith.select %118, %115, %124 : vector<8x1xi1>, vector<8x1xf32>
    %127 = arith.subf %125, %126 : vector<8x1xf32>
    %cst_35 = arith.constant 4.500000e-01 : f32
    %128 = vector.broadcast %cst_35 : f32 to vector<8x1xf32>
    %129 = arith.mulf %127, %128 : vector<8x1xf32>
    %130 = arith.addf %126, %129 : vector<8x1xf32>
    %131 = arith.subf %130, %66 : vector<8x1xf32>
    %132 = vector.broadcast %1 : f32 to vector<8x1xf32>
    %133 = arith.mulf %131, %132 : vector<8x1xf32>
    %134 = arith.addf %66, %133 : vector<8x1xf32>
    %cst_36 = arith.constant 9.99999982E-15 : f32
    %135 = vector.broadcast %cst_36 : f32 to vector<8x1xf32>
    %136 = arith.cmpf ogt, %134, %135 : vector<8x1xf32>
    %137 = arith.extui %136 : vector<8x1xi1> to vector<8x1xi32>
    %138 = arith.sitofp %137 : vector<8x1xi32> to vector<8x1xf32>
    %139 = arith.mulf %134, %138 : vector<8x1xf32>
    %cst_37 = arith.constant 1.000000e+00 : f32
    %140 = vector.broadcast %cst_37 : f32 to vector<8x1xf32>
    %141 = arith.subf %140, %138 : vector<8x1xf32>
    %142 = arith.addf %139, %141 : vector<8x1xf32>
    %143 = tpu.reciprocal %142 {approx = true} : vector<8x1xf32> -> vector<8x1xf32>
    %144 = arith.mulf %142, %143 : vector<8x1xf32>
    %cst_38 = arith.constant 2.000000e+00 : f32
    %145 = vector.broadcast %cst_38 : f32 to vector<8x1xf32>
    %146 = arith.subf %145, %144 : vector<8x1xf32>
    %147 = arith.mulf %143, %146 : vector<8x1xf32>
    %148 = vector.broadcast %2 : f32 to vector<8x1xf32>
    %149 = arith.mulf %148, %147 : vector<8x1xf32>
    %150 = arith.mulf %134, %138 : vector<8x1xf32>
    %151 = math.absf %0 : vector<8x256xf32>
    %152 = vector.broadcast %150 : vector<8x1xf32> to vector<8x256xf32>
    %153 = arith.subf %151, %152 : vector<8x256xf32>
    %154 = vector.broadcast %149 : vector<8x1xf32> to vector<8x256xf32>
    %155 = arith.mulf %154, %153 : vector<8x256xf32>
    %cst_39 = arith.constant 5.000000e-01 : f32
    %156 = vector.broadcast %cst_39 : f32 to vector<8x256xf32>
    %157 = arith.mulf %156, %155 : vector<8x256xf32>
    %158 = math.tanh %157 : vector<8x256xf32>
    %cst_40 = arith.constant 1.000000e+00 : f32
    %159 = vector.broadcast %cst_40 : f32 to vector<8x256xf32>
    %160 = arith.addf %158, %159 : vector<8x256xf32>
    %cst_41 = arith.constant 5.000000e-01 : f32
    %161 = vector.broadcast %cst_41 : f32 to vector<8x256xf32>
    %162 = arith.mulf %161, %160 : vector<8x256xf32>
    %cst_42 = arith.constant 0.000000e+00 : f32
    %163 = vector.broadcast %cst_42 : f32 to vector<8x256xf32>
    %164 = arith.maximumf %0, %163 : vector<8x256xf32>
    %165 = arith.mulf %164, %162 : vector<8x256xf32>
    %c0_43 = arith.constant 0 : index
    %c0_44 = arith.constant 0 : index
    %166 = vector.load %arg4[%c0_43, %c0_44] : memref<8x256xf32, #tpu.memory_space<vmem>>, vector<8x256xf32>
    tpu.vector_store %arg4[%c0_43, %c0_44], %165 {strides = array<i32>} : memref<8x256xf32, #tpu.memory_space<vmem>>, vector<8x256xf32>,
    return
  }
  func.func @transform_0(%arg0: i32) -> i32 {
    %c0_i32 = arith.constant 0 : i32
    %c0_i32_0 = arith.constant 0 : i32
    return %c0_i32 : i32
  }
  func.func @transform_1(%arg0: i32) -> i32 {
    %c0_i32 = arith.constant 0 : i32
    %c0_i32_0 = arith.constant 0 : i32
    return %c0_i32 : i32
  }
  func.func @transform_2(%arg0: i32) -> (i32, i32) {
    %c0_i32 = arith.constant 0 : i32
    %c0_i32_0 = arith.constant 0 : i32
    return %arg0, %c0_i32 : i32, i32
  }
  func.func @transform_3(%arg0: i32) -> (i32, i32) {
    %c0_i32 = arith.constant 0 : i32
    %c0_i32_0 = arith.constant 0 : i32
    return %arg0, %c0_i32 : i32, i32
  }
}

</mosaic_0001>

<bundles_post_ra>
// kernel: tpu_custom_call.1
= control target key start
LH: loop header
LB: loop body
LE: loop exit
PB: predicated region body
PF: predicated region fallthrough
CT: control target
= control target key end

     0   :  { %10 = vsyncpa [#allocation5], 0  ;;  %s444_s0 = inlined_call_operand.<no memory space> [shape: f32[1], index: 0, kind: input, shape index: {}]   ;;  %s445_s1 = inlined_call_operand.<no memory space> [shape: f32[1], index: 1, kind: input, shape index: {}]   ;;  %s446_s2 = inlined_call_operand.hbm [shape: f32[8,256], index: 2, kind: input, shape index: {}]   ;;  %s447_s3 = inlined_call_operand.hbm [shape: f32[8,256], index: 3, kind: output, shape index: {}]  }
   0x1   :  { %11 = vsyncpa [#allocation6], 0  ;;  %s290_s12 = smov [#allocation4]  }
   0x2   :  { %s22_s13 = sshll.u32 %s290_s12, 4  ;;  %s23_s13 = int_to_ptr.vmem [resolvable:$true] %s22_s13 }
   0x3   :  { %s254_s14 = scalar_lea.vmem %s23_s13, 256  ;;  %p259_p1 = scmp.lt.s32.totalorder %s23_s13, %s23_s13 }
   0x4   :  { %p255_p0 = scmp.ne.s32.totalorder %s23_s13, %s254_s14  ;;  %p260_p2 = scmp.lt.s32.totalorder %s254_s14, %s254_s14 }
   0x6   :  { %p261_p3 = por %p260_p2, %p259_p1 }
   0x8   :  { %p262_p4 = pnand %p261_p3, %p255_p0 }
   0xa   :  { %265 = shalt.err (!%p262_p4)
}
   0xb   :  { %25 = dma.hbm_to_vmem [thread:$0]  %s446_s2, 256, %s23_s13, [#allocation5]  }
   0xc   :  { %286 = dma.done.wait [#allocation5], 256  }
   0xd   :  { %287 = vsyncadd [#allocation5], 4294967040  ;;  %v316_v0 = vld [vmem:[#allocation4] sm:$0xff]  ;;  %v318_v1 = vld [vmem:[#allocation4 + $0x8] sm:$0xff]  ;;  %v291_v17 = vmov 0.0  }
   0xe   :  { %v33_v2 = vmin.f32 %v316_v0, %v318_v1  ;;  %v103_v3 = vmax.f32 %v316_v0, %v318_v1 }
  0x10   :  { %34 = vmin.xlane.f32.xlu0 %v33_v2 }
  0x14   :  { %104 = vmax.xlane.f32.xlu0 %v103_v3 }
  0x99   :  { %v324_v4 = vpop.xlane.xlu0 %34 }
  0x9a   :  { %vm47_vm0 = vcmp.gt.f32.partialorder %v316_v0, %v324_v4  ;;  %vm48_vm1 = vcmp.gt.f32.partialorder %v318_v1, %v324_v4  ;;  %vm36_vm6 = vcmp.le.f32.partialorder %v316_v0, %v324_v4  ;;  %vm37_vm7 = vcmp.le.f32.partialorder %v318_v1, %v324_v4 }
  0x9b   :  { %v49_v5 = vsel %vm47_vm0, %v316_v0, inf  ;;  %v50_v6 = vsel %vm48_vm1, %v318_v1, inf  ;;  %v224_v18 = vsel %vm36_vm6, 1.0, %v291_v17  ;;  %v225_v19 = vsel %vm37_vm7, 1.0, %v291_v17 }
  0x9c   :  { %v51_v7 = vmin.f32 %v49_v5, %v50_v6  ;;  %v42_v22 = vadd.f32 %v225_v19, %v224_v18 }
  0x9d   :  { %v332_v8 = vpop.xlane.xlu0 %104 }
  0x9e   :  { %52 = vmin.xlane.f32.xlu1 %v51_v7  ;;  %vm117_vm2 = vcmp.lt.f32.partialorder %v316_v0, %v332_v8  ;;  %vm118_vm3 = vcmp.lt.f32.partialorder %v318_v1, %v332_v8  ;;  %vm106_vm8 = vcmp.ge.f32.partialorder %v316_v0, %v332_v8  ;;  %vm107_vm9 = vcmp.ge.f32.partialorder %v318_v1, %v332_v8 }
  0x9f   :  { %v119_v9 = vsel %vm117_vm2, %v316_v0, -inf  ;;  %v120_v10 = vsel %vm118_vm3, %v318_v1, -inf  ;;  %v230_v26 = vsel %vm106_vm8, 1.0, %v291_v17  ;;  %v231_v27 = vsel %vm107_vm9, 1.0, %v291_v17 }
  0xa0   :  { %v121_v11 = vmax.f32 %v119_v9, %v120_v10  ;;  %v112_v29 = vadd.f32 %v231_v27, %v230_v26  ;;  %v189_v26 = vand.u32 2147483647, %v316_v0  ;;  %v190_v27 = vand.u32 2147483647, %v318_v1 }
  0xa2   :  { %122 = vmax.xlane.f32.xlu1 %v121_v11 }
 0x127   :  { %v340_v12 = vpop.xlane.xlu1 %52 }
 0x128   :  { %vm69_vm4 = vcmp.gt.f32.partialorder %v316_v0, %v340_v12  ;;  %vm70_vm5 = vcmp.gt.f32.partialorder %v318_v1, %v340_v12  ;;  %vm54_vm12 = vcmp.le.f32.partialorder %v316_v0, %v340_v12  ;;  %vm55_vm13 = vcmp.le.f32.partialorder %v318_v1, %v340_v12 }
 0x129   :  { %v71_v13 = vsel %vm69_vm4, %v316_v0, inf  ;;  %v72_v14 = vsel %vm70_vm5, %v318_v1, inf  ;;  %v226_v24 = vsel %vm54_vm12, 1.0, %v291_v17  ;;  %v227_v25 = vsel %vm55_vm13, 1.0, %v291_v17 }
 0x12a   :  { %v73_v15 = vmin.f32 %v71_v13, %v72_v14  ;;  %v60_v28 = vadd.f32 %v227_v25, %v226_v24 }
 0x12b   :  { %v352_v16 = vpop.xlane.xlu1 %122 }
 0x12c   :  { %74 = vmin.xlane.f32.xlu0 %v73_v15  ;;  %vm139_vm10 = vcmp.lt.f32.partialorder %v316_v0, %v352_v16  ;;  %vm140_vm11 = vcmp.lt.f32.partialorder %v318_v1, %v352_v16  ;;  %vm124_vm14 = vcmp.ge.f32.partialorder %v316_v0, %v352_v16  ;;  %vm125_vm15 = vcmp.ge.f32.partialorder %v318_v1, %v352_v16 }
 0x12d   :  { %v141_v20 = vsel %vm139_vm10, %v316_v0, -inf  ;;  %v142_v21 = vsel %vm140_vm11, %v318_v1, -inf  ;;  %v232_v30 = vsel %vm124_vm14, 1.0, %v291_v17  ;;  %v233_v31 = vsel %vm125_vm15, 1.0, %v291_v17 }
 0x12e   :  { %v143_v23 = vmax.f32 %v141_v20, %v142_v21  ;;  %v130_v32 = vadd.f32 %v233_v31, %v232_v30 }
 0x130   :  { %43 = vadd.xlane.f32.xlu0 %v42_v22  ;;  %144 = vmax.xlane.f32.xlu1 %v143_v23 }
 0x134   :  { %61 = vadd.xlane.f32.xlu1 %v60_v28  ;;  %113 = vadd.xlane.f32.xlu0 %v112_v29  ;;  %v187_v28 = vstv %s445_s1 }
 0x138   :  { %131 = vadd.xlane.f32.xlu1 %v130_v32 }
 0x1b5   :  { %v75_v33 = vpop.xlane.xlu0 %74 }
 0x1b6   :  { %vm76_vm0 = vcmp.le.f32.partialorder %v316_v0, %v75_v33  ;;  %vm77_vm1 = vcmp.le.f32.partialorder %v318_v1, %v75_v33  ;;  %vm91_vm2 = vcmp.gt.f32.partialorder %v316_v0, %v75_v33  ;;  %vm92_vm3 = vcmp.gt.f32.partialorder %v318_v1, %v75_v33 }
 0x1b7   :  { %v228_v34 = vsel %vm76_vm0, 1.0, %v291_v17  ;;  %v229_v35 = vsel %vm77_vm1, 1.0, %v291_v17  ;;  %v93_v38 = vsel %vm91_vm2, %v316_v0, inf  ;;  %v94_v39 = vsel %vm92_vm3, %v318_v1, inf }
 0x1b8   :  { %v82_v36 = vadd.f32 %v229_v35, %v228_v34  ;;  %v95_v43 = vmin.f32 %v93_v38, %v94_v39  ;;  %v203_v39 = vmax.f32 %v316_v0, 0.0 }
 0x1b9   :  { %v145_v37 = vpop.xlane.xlu1 %144  ;;  %v44_v47 = vpop.xlane.xlu0 %43 }
 0x1ba   :  { %83 = vadd.xlane.f32.xlu0 %v82_v36  ;;  %vm146_vm4 = vcmp.ge.f32.partialorder %v316_v0, %v145_v37  ;;  %vm147_vm5 = vcmp.ge.f32.partialorder %v318_v1, %v145_v37  ;;  %vm161_vm6 = vcmp.lt.f32.partialorder %v316_v0, %v145_v37  ;;  %vm162_vm7 = vcmp.lt.f32.partialorder %v318_v1, %v145_v37 }
 0x1bb   :  { %v234_v40 = vsel %vm146_vm4, 1.0, %v291_v17  ;;  %v235_v41 = vsel %vm147_vm5, 1.0, %v291_v17  ;;  %v163_v44 = vsel %vm161_vm6, %v316_v0, -inf  ;;  %v164_v45 = vsel %vm162_vm7, %v318_v1, -inf }
 0x1bc   :  { %v152_v42 = vadd.f32 %v235_v41, %v234_v40  ;;  %v165_v46 = vmax.f32 %v163_v44, %v164_v45  ;;  %vm45_vm10 = vcmp.ge.f32.partialorder %v44_v47, 3.0  ;;  %vm46_vm12 = vcmp.ge.f32.partialorder %v44_v47, 4.0 }
 0x1bd   :  { %v62_v48 = vpop.xlane.xlu1 %61  ;;  %v114_v49 = vpop.xlane.xlu0 %113  ;;  %v63_v55 = vsel %vm45_vm10, %v324_v4, %v340_v12  ;;  %v66_v56 = vsel %vm46_vm12, %v324_v4, %v340_v12  ;;  %v204_v41 = vmax.f32 %v318_v1, 0.0 }
 0x1be   :  { %153 = vadd.xlane.f32.xlu1 %v152_v42  ;;  %96 = vmin.xlane.f32.xlu0 %v95_v43  ;;  %vm64_vm8 = vcmp.ge.f32.partialorder %v62_v48, 3.0  ;;  %vm67_vm9 = vcmp.ge.f32.partialorder %v62_v48, 4.0  ;;  %vm115_vm15 = vcmp.ge.f32.partialorder %v114_v49, 3.0  ;;  %vm116_vm5 = vcmp.ge.f32.partialorder %v114_v49, 4.0 }
 0x1bf   :  { %vm396_vm13 = vmor %vm45_vm10, %vm64_vm8  ;;  %v133_v2 = vsel %vm115_vm15, %v332_v8, %v352_v16  ;;  %v136_v3 = vsel %vm116_vm5, %v332_v8, %v352_v16  ;;  %v174_v8 = vstv %s444_s0  ;;  %s292_s0 = smov [#allocation7]  }
 0x1c0   :  { %vm400_vm14 = vmor %vm46_vm12, %vm67_vm9  ;;  %v85_v58 = vsel %vm396_vm13, %v63_v55, %v75_v33  ;;  %s215_s1 = sshll.u32 %s292_s0, 4  ;;  %s216_s1 = int_to_ptr.vmem [resolvable:$true] %s215_s1 }
 0x1c1   :  { %v132_v50 = vpop.xlane.xlu1 %131  ;;  %v88_v59 = vsel %vm400_vm14, %v66_v56, %v75_v33  ;;  %s266_s20 = scalar_lea.vmem %s216_s1, 256  ;;  %p271_p6 = scmp.lt.s32.totalorder %s216_s1, %s216_s1 }
 0x1c2   :  { %166 = vmax.xlane.f32.xlu1 %v165_v46  ;;  %vm134_vm11 = vcmp.ge.f32.partialorder %v132_v50, 3.0  ;;  %vm137_vm3 = vcmp.ge.f32.partialorder %v132_v50, 4.0  ;;  %p267_p5 = scmp.ne.s32.totalorder %s216_s1, %s266_s20  ;;  %p272_p7 = scmp.lt.s32.totalorder %s266_s20, %s266_s20 }
 0x1c3   :  { %vm405_vm2 = vmor %vm115_vm15, %vm134_vm11 }
 0x1c4   :  { %vm138_vm7 = vmor %vm116_vm5, %vm137_vm3  ;;  %v155_v5 = vsel %vm405_vm2, %v133_v2, %v145_v37  ;;  %p273_p8 = por %p272_p7, %p271_p6 }
 0x1c5   :  { %v158_v6 = vsel %vm138_vm7, %v136_v3, %v145_v37 }
 0x1c6   :  { %p274_p9 = pnand %p273_p8, %p267_p5 }
 0x243   :  { %v84_v52 = vpop.xlane.xlu0 %83 }
 0x244   :  { %vm86_vm0 = vcmp.ge.f32.partialorder %v84_v52, 3.0  ;;  %vm89_vm1 = vcmp.ge.f32.partialorder %v84_v52, 4.0 }
 0x245   :  { %vm87_vm4 = vmor %vm396_vm13, %vm86_vm0 }
 0x246   :  { %vm90_vm6 = vmor %vm400_vm14, %vm89_vm1 }
 0x247   :  { %v154_v57 = vpop.xlane.xlu1 %153  ;;  %v97_v60 = vpop.xlane.xlu0 %96 }
 0x248   :  { %vm156_vm8 = vcmp.ge.f32.partialorder %v154_v57, 3.0  ;;  %vm159_vm9 = vcmp.ge.f32.partialorder %v154_v57, 4.0  ;;  %v98_v61 = vsel %vm87_vm4, %v85_v58, %v97_v60  ;;  %v99_v62 = vsel %vm90_vm6, %v88_v59, %v97_v60 }
 0x249   :  { %v100_v63 = vsub.f32 %v99_v62, %v98_v61  ;;  %vm157_vm10 = vmor %vm405_vm2, %vm156_vm8 }
 0x24a   :  { %vm160_vm11 = vmor %vm138_vm7, %vm159_vm9 }
 0x24b   :  { %v167_v4 = vpop.xlane.xlu1 %166  ;;  %v101_v10 = vmul.f32 0.55, %v100_v63 }
 0x24c   :  { %v168_v7 = vsel %vm157_vm10, %v155_v5, %v167_v4  ;;  %v169_v9 = vsel %vm160_vm11, %v158_v6, %v167_v4 }
 0x24d   :  { %v170_v11 = vsub.f32 %v168_v7, %v169_v9  ;;  %v102_v13 = vadd.f32 %v101_v10, %v98_v61 }
 0x24f   :  { %v171_v12 = vmul.f32 0.45, %v170_v11 }
 0x251   :  { %v172_v14 = vadd.f32 %v171_v12, %v169_v9 }
 0x253   :  { %v173_v15 = vsub.f32 %v172_v14, %v102_v13 }
 0x255   :  { %v175_v16 = vmul.f32 %v174_v8, %v173_v15 }
 0x257   :  { %v176_v18 = vadd.f32 %v175_v16, %v102_v13 }
 0x259   :  { %vm177_vm12 = vcmp.gt.f32.partialorder %v176_v18, 1e-14 }
 0x25a   :  { %v236_v19 = vsel %vm177_vm12, 1.0, %v291_v17 }
 0x25b   :  { %v180_v20 = vmul.f32 %v236_v19, %v176_v18  ;;  %v181_v21 = vsub.f32 1.0, %v236_v19 }
 0x25d   :  { %v182_v22 = vadd.f32 %v181_v21, %v180_v20  ;;  %v191_v31 = vsub.f32 %v189_v26, %v180_v20  ;;  %v192_v32 = vsub.f32 %v190_v27, %v180_v20 }
 0x25f   :  { %240 = vrcp.f32 %v182_v22 }
 0x26c   :  { %v241_v23 = vpop.eup %240 }
 0x26d   :  { %v184_v24 = vmul.f32 %v241_v23, %v182_v22 }
 0x26f   :  { %v185_v25 = vsub.f32 2.0, %v184_v24 }
 0x271   :  { %v186_v29 = vmul.f32 %v241_v23, %v185_v25 }
 0x273   :  { %v188_v30 = vmul.f32 %v187_v28, %v186_v29 }
 0x275   :  { %v193_v17 = vmul.f32 %v191_v31, %v188_v30  ;;  %v194_v33 = vmul.f32 %v192_v32, %v188_v30 }
 0x277   :  { %v195_v34 = vmul.f32 0.5, %v193_v17  ;;  %v196_v35 = vmul.f32 0.5, %v194_v33 }
 0x279   :  { %242 = vtanh.f32 %v195_v34 }
 0x27a   :  { %244 = vtanh.f32 %v196_v35 }
 0x286   :  { %v243_v36 = vpop.eup %242 }
 0x287   :  { %v245_v37 = vpop.eup %244  ;;  %v199_v38 = vadd.f32 1.0, %v243_v36 }
 0x288   :  { %v200_v40 = vadd.f32 1.0, %v245_v37 }
 0x289   :  { %v201_v42 = vmul.f32 0.5, %v199_v38 }
 0x28a   :  { %v202_v43 = vmul.f32 0.5, %v200_v40 }
 0x28b   :  { %v205_v44 = vmul.f32 %v203_v39, %v201_v42 }
 0x28c   :  { %v206_v45 = vmul.f32 %v204_v41, %v202_v43 }
 0x28d   :  { %207 = vst [vmem:[#allocation7] sm:$0xff] %v205_v44 }
 0x28e   :  { %208 = vst [vmem:[#allocation7 + $0x8] sm:$0xff] %v206_v45 }
 0x28f   :  { %277 = shalt.err (!%p274_p9)
}
 0x290   :  { %218 = dma.vmem_to_hbm [thread:$0]  %s216_s1, 256, %s447_s3, [#allocation6]  }
 0x291   :  { %288 = dma.done.wait [#allocation6], 256  }
 0x292   :  { %289 = vsyncadd [#allocation6], 4294967040 }
 0x293   :  { %222 = vsyncpa [#allocation5], 1 }
 0x294   :  { %223 = vsyncpa [#allocation6], 1 }

</bundles_post_ra>
